<compile_context>
chip_gen: v7x
topology: tpu7x:2x2x1
jax: 0.10.0
libtpu: 0.0.40
codegen_flags: <defaults>
</compile_context>

<pallas_src>
import jax
import jax.numpy as jnp
from jax.experimental import pallas as pl
from jax.experimental.pallas import tpu as pltpu

CIN, COUT, KH, KW = 3, 64, 3, 3
K = KH * KW * CIN          # 27
KP = 32                    # K padded up to a sublane multiple (row 27 carries the bias)


def conv_relu_kernel(p_ref, w_ref, o_ref):
    # p_ref: (KP, tile)    im2col patches, K on sublanes, fused N*H*W on lanes
    # w_ref: (COUT, KP)    flattened conv weights + bias column (shared across grid)
    # o_ref: (COUT, tile)  output tile -- lane-dense, unmasked full-lane stores
    acc = jnp.dot(w_ref[...], p_ref[...],
                  preferred_element_type=jnp.float32)     # single MXU push per tile
    o_ref[...] = jnp.maximum(acc, 0.0).astype(o_ref.dtype)  # ReLU on the VPU


def _choose_lane_tile(fused):
    """Lane-axis tile: multiple of 128, divides `fused`, >=2 tiles when possible
    (keeps both v7x TensorCores busy), capped at 8192 lanes so the per-step block
    stays far below v7x's 64 MiB VMEM even at large H*W."""
    if fused % 128 != 0:
        return fused                       # single full-extent block (still legal)
    cap = min(fused // 2, 8192)
    t = (cap // 128) * 128
    while t >= 128:
        if fused % t == 0:
            return t
        t -= 128
    return fused


@jax.jit
def simplenet_forward(x_nchw, w_oihw, bias):
    """x_nchw: (N, 3, H, W) f32; w_oihw: (64, 3, 3, 3); bias: (64,) -> (N, 64, H, W)."""
    N, C, H, W = x_nchw.shape
    assert C == CIN
    HW = H * W
    fused = N * HW
    tile = _choose_lane_tile(fused)
    num_tiles = fused // tile

    # Spatial zero-pad by 1 (padding=(1,1)) -- stays NCHW.
    x_pad = jnp.pad(x_nchw, ((0, 0), (0, 0), (1, 1), (1, 1)))

    # im2col in XLA, K-major with batch folded into lanes:
    #   patches[(kh*KW+kw)*CIN + ci, n*HW + y*W + x] = x_pad[n, ci, y+kh, x+kw]
    taps = [x_pad[:, :, kh:kh + H, kw:kw + W]
            for kh in range(KH) for kw in range(KW)]
    patches = jnp.concatenate(taps, axis=1).reshape(N, K, HW)        # (N, 27, HW)
    patches = jnp.transpose(patches, (1, 0, 2)).reshape(K, fused)    # (27, N*HW)
    # K padding 27 -> 32: row 27 = 1.0 (bias ride-along), rows 28..31 = 0.
    patches = jnp.concatenate(
        [patches,
         jnp.ones((1, fused), patches.dtype),
         jnp.zeros((KP - K - 1, fused), patches.dtype)], axis=0)     # (32, N*HW)

    # Weights (COUT, CIN, KH, KW) -> (COUT, K) in matching K-order; column 27 = bias.
    wt = jnp.transpose(w_oihw, (0, 2, 3, 1)).reshape(COUT, K)
    wt = jnp.concatenate(
        [wt, bias.reshape(COUT, 1),
         jnp.zeros((COUT, KP - K - 1), wt.dtype)], axis=1)           # (64, 32)

    cost = pl.CostEstimate(
        flops=2 * COUT * KP * fused,
        transcendentals=0,
        bytes_accessed=(KP * fused + COUT * KP + COUT * fused) * 4)

    out2d = pl.pallas_call(
        conv_relu_kernel,
        out_shape=jax.ShapeDtypeStruct((COUT, fused), jnp.float32),
        grid_spec=pltpu.PrefetchScalarGridSpec(
            num_scalar_prefetch=0,
            grid=(num_tiles,),
            in_specs=[
                pl.BlockSpec((KP, tile), lambda t: (0, t)),
                pl.BlockSpec((COUT, KP), lambda t: (0, 0)),
            ],
            out_specs=pl.BlockSpec((COUT, tile), lambda t: (0, t)),
        ),
        compiler_params=pltpu.CompilerParams(
            dimension_semantics=("parallel",)),   # lane tiles shard across TCs on v7x
        cost_estimate=cost,
    )(patches, wt)

    # (COUT, N*HW) -> (N, COUT, H, W): tiny XLA transpose/reshape outside the kernel.
    return jnp.transpose(out2d.reshape(COUT, N, HW), (1, 0, 2)).reshape(N, COUT, H, W)


if __name__ == "__main__":
    key = jax.random.PRNGKey(0)
    kx, kw, kb = jax.random.split(key, 3)

    # Small, module-consistent shapes: batch=2, in-channels=3, spatial=16x16.
    N, H, W = 2, 16, 16
    x = jax.random.normal(kx, (N, CIN, H, W), dtype=jnp.float32)

    # Deterministic parameter init (kaiming-uniform-like bounds, as in Conv2d.__init__).
    fan_in = CIN * KH * KW
    bound = 1.0 / (fan_in ** 0.5)
    w = jax.random.uniform(kw, (COUT, CIN, KH, KW), jnp.float32, -bound, bound)
    b = jax.random.uniform(kb, (COUT,), jnp.float32, -bound, bound)

    out = simplenet_forward(x, w, b)
    out = jax.block_until_ready(out)

    # Cross-check against XLA's conv for correctness.
    ref = jax.lax.conv_general_dilated(
        x, w, window_strides=(1, 1), padding=((1, 1), (1, 1)),
        dimension_numbers=("NCHW", "OIHW", "NCHW"))
    ref = jnp.maximum(ref + b.reshape(1, COUT, 1, 1), 0.0)
    assert out.shape == (N, COUT, H, W)
    assert jnp.allclose(out, ref, atol=1e-4, rtol=1e-4)

    print("KERNEL_OK")
</pallas_src>

<mosaic_0001>
module attributes {stable_mosaic.version = 11 : i64} {
  func.func @conv_relu_kernel(%arg0: i32, %arg1: memref<32x256xf32, #tpu.memory_space<vmem>>, %arg2: memref<64x32xf32, #tpu.memory_space<vmem>>, %arg3: memref<64x256xf32, #tpu.memory_space<vmem>>) attributes {dimension_semantics = [#tpu.dimension_semantics<parallel>], iteration_bounds = array<i64: 2>, scalar_prefetch = 0 : i64, scratch_operands = 0 : i64, tpu.core_type = #tpu.core_type<tc>, window_params = [{transform_indices = @transform_0, window_bounds = array<i64: 32, 256>}, {pipeline_mode = #tpu.pipeline_mode<synchronous>, transform_indices = @transform_1, window_bounds = array<i64: 64, 32>}, {transform_indices = @transform_2, window_bounds = array<i64: 64, 256>}]} {
    %c0 = arith.constant 0 : index
    %c0_0 = arith.constant 0 : index
    %0 = vector.load %arg2[%c0, %c0_0] : memref<64x32xf32, #tpu.memory_space<vmem>>, vector<64x32xf32>
    %c0_1 = arith.constant 0 : index
    %c0_2 = arith.constant 0 : index
    %1 = vector.load %arg1[%c0_1, %c0_2] : memref<32x256xf32, #tpu.memory_space<vmem>>, vector<32x256xf32>
    %cst = arith.constant dense<0.000000e+00> : vector<64x256xf32>
    %2 = tpu.matmul %0, %1, %cst {dimension_numbers = #tpu.dot_dimension_numbers<[1], [0], [0], [1], [0, 0, 1, 1], [], []>} : vector<64x32xf32>, vector<32x256xf32>, vector<64x256xf32> -> vector<64x256xf32>
    %cst_3 = arith.constant 0.000000e+00 : f32
    %3 = vector.broadcast %cst_3 : f32 to vector<64x256xf32>
    %4 = arith.maximumf %2, %3 : vector<64x256xf32>
    %c0_4 = arith.constant 0 : index
    %c0_5 = arith.constant 0 : index
    %5 = vector.load %arg3[%c0_4, %c0_5] : memref<64x256xf32, #tpu.memory_space<vmem>>, vector<64x256xf32>
    tpu.vector_store %arg3[%c0_4, %c0_5], %4 {strides = array<i32>} : memref<64x256xf32, #tpu.memory_space<vmem>>, vector<64x256xf32>,
    return
  }
  func.func @transform_0(%arg0: i32) -> (i32, i32) {
    %c0_i32 = arith.constant 0 : i32
    %c0_i32_0 = arith.constant 0 : i32
    return %c0_i32, %arg0 : i32, i32
  }
  func.func @transform_1(%arg0: i32) -> (i32, i32) {
    %c0_i32 = arith.constant 0 : i32
    %c0_i32_0 = arith.constant 0 : i32
    %c0_i32_1 = arith.constant 0 : i32
    return %c0_i32, %c0_i32_0 : i32, i32
  }
  func.func @transform_2(%arg0: i32) -> (i32, i32) {
    %c0_i32 = arith.constant 0 : i32
    %c0_i32_0 = arith.constant 0 : i32
    return %c0_i32, %arg0 : i32, i32
  }
}

</mosaic_0001>

<bundles_post_ra>
// kernel: simplenet_forward.1
= control target key start
LH: loop header
LB: loop body
LE: loop exit
PB: predicated region body
PF: predicated region fallthrough
CT: control target
= control target key end

     0   :  { %s575_s9 = smov 0   ;;  %s577_s10 = smov 0   ;;  %s705_s0 = inlined_call_operand.vmem [shape: f32[32,512], index: 0, kind: input, shape index: {}]   ;;  %s706_s1 = inlined_call_operand.vmem [shape: f32[64,32], index: 1, kind: input, shape index: {}]   ;;  %s707_s2 = inlined_call_operand.vmem [shape: f32[64,512], index: 2, kind: output, shape index: {}]  }
   0x1   :  { %s579_s11 = smov 0  }
   0x2 LB: > { %s473_s12 = sadd.s32 4294967295, %s557_s11   ;;  %s592_s13 = sadd.s32 1, %s557_s11   ;;  %s557_s11 = sphi %s579_s11, %s711_s11   ;;  %s553_s10 = sphi %s577_s10, %s710_s10   ;;  %s549_s9 = sphi %s575_s9, %s709_s9  }
   0x3   : > { %s16_s14 = ssub.s32 %s557_s11, %s592_s13  ;;  %s19_s15 = sadd.s32 1, %s553_s10 }
   0x4   : > { %p17_p0 = scmp.eq.s32.totalorder %s16_s14, 0  ;;  %p26_p1 = scmp.ne.s32.totalorder %s553_s10, %s549_s9 }
   0x5   : > { %p27_p2 = scmp.eq.s32.totalorder %s557_s11, 0  ;;  %p77_p3 = scmp.eq.s32.totalorder %s473_s12, 1 }
   0x6   : > { %s603_s16 = scalar_select %p17_p0, %s553_s10, %s19_s15  }
   0x7   : > { %p28_p4 = por %p27_p2, %p26_p1  ;;  %p605_p5 = por %p77_p3, %p26_p1 }
   0x8   : > { %p476_p6 = scmp.ge.s32.totalorder %s557_s11, 2 }
   0xa   : > { %102 = sbr.rel (%p476_p6) target bundleno = 25 (0x19), region = 20 }
  0x11   : > { %105 = sbr.rel (!%p28_p4) target bundleno = 25 (0x19), region = 24  ;;  %s107_s18 = sand.u32 (%p28_p4), 1, %s553_s10  }
  0x12   : > { %s496_s19 = sshll.u32 (%p28_p4), %s557_s11, 4  ;;  %s477_s20 = sshll.u32 (%p28_p4), %s107_s18, 6 }
  0x13   : > { %s112_s23 = scalar_lea.vmem (%p28_p4), %s705_s0, %s496_s19  ;;  %s109_s24 = scalar_lea.vmem (%p28_p4), [#allocation2], %s477_s20 }
  0x14   : > { %v125_v0 = vld [vmem:[%s112_s23] sm:$0xff] (%p28_p4)  ;;  %v127_v1 = vld [vmem:[%s112_s23 + $0x8] sm:$0xff] (%p28_p4) }
  0x15   : > { %v129_v2 = vld [vmem:[%s112_s23 + $0x20] sm:$0xff] (%p28_p4)  ;;  %126 = vst [vmem:[%s109_s24] sm:$0xff] (%p28_p4), %v125_v0  ;;  %128 = vst [vmem:[%s109_s24 + $0x8] sm:$0xff] (%p28_p4), %v127_v1  ;;  %v131_v3 = vld [vmem:[%s112_s23 + $0x28] sm:$0xff] (%p28_p4) }
  0x16   : > { %130 = vst [vmem:[%s109_s24 + $0x10] sm:$0xff] (%p28_p4), %v129_v2  ;;  %v133_v4 = vld [vmem:[%s112_s23 + $0x40] sm:$0xff] (%p28_p4)  ;;  %v135_v5 = vld [vmem:[%s112_s23 + $0x48] sm:$0xff] (%p28_p4)  ;;  %132 = vst [vmem:[%s109_s24 + $0x18] sm:$0xff] (%p28_p4), %v131_v3 }
  0x17   : > { %134 = vst [vmem:[%s109_s24 + $0x20] sm:$0xff] (%p28_p4), %v133_v4  ;;  %136 = vst [vmem:[%s109_s24 + $0x28] sm:$0xff] (%p28_p4), %v135_v5  ;;  %v137_v6 = vld [vmem:[%s112_s23 + $0x60] sm:$0xff] (%p28_p4)  ;;  %v139_v7 = vld [vmem:[%s112_s23 + $0x68] sm:$0xff] (%p28_p4) }
  0x18   : > { %138 = vst [vmem:[%s109_s24 + $0x30] sm:$0xff] %v137_v6  ;;  %140 = vst [vmem:[%s109_s24 + $0x38] sm:$0xff] %v139_v7 }
  0x19 PF: > { %p480_p7 = scmp.ge.s32.totalorder %s557_s11, 1  ;;  %p145_p8 = scmp.lt.s32.totalorder %s557_s11, 3 }
  0x1b   : > { %p146_p9 = pnand %p480_p7, %p145_p8 }
  0x1c   : > { %s152_s25 = sand.u32 (!%p146_p9), 1, %s549_s9   ;;  %v559_v8 = vmov (!%p146_p9), 0.0   ;;  %v174_v21 = vld [vmem:[%s706_s1] sm:$0xff] (!%p146_p9)  ;;  %vm190_vm0 = vcmask (!%p146_p9), 261120   ;;  %v175_v23 = vld [vmem:[%s706_s1 + $0x8] sm:$0xff] (!%p146_p9)  ;;  %v176_v25 = vld [vmem:[%s706_s1 + $0x10] sm:$0xff] (!%p146_p9) }
  0x1d   : > { %149 = sbr.rel (%p146_p9) target bundleno = 279 (0x117), region = 47  ;;  %s481_s26 = sshll.u32 (!%p146_p9), %s152_s25, 6  ;;  %279 = vmatprep.mubr.f32.mxu0 (!%p146_p9), %v559_v8  ;;  %303 = vmatprep.mubr.f32.mxu1 (!%p146_p9), %v559_v8  ;;  %v178_v22 = vld [vmem:[%s706_s1 + $0x20] sm:$0xff] (!%p146_p9)  ;;  %v179_v24 = vld [vmem:[%s706_s1 + $0x28] sm:$0xff] (!%p146_p9)  ;;  %v180_v26 = vld [vmem:[%s706_s1 + $0x30] sm:$0xff] (!%p146_p9) }
  0x1e   : > { %s154_s27 = scalar_lea.vmem (!%p146_p9), [#allocation2], %s481_s26  ;;  %v177_v27 = vld [vmem:[%s706_s1 + $0x18] sm:$0xff] (!%p146_p9)  ;;  %s482_s23 = sshll.u32 (!%p146_p9), %s152_s25, 7 }
  0x1f   : > { %v183_v9 = vld [vmem:[%s154_s27 + $0x8] sm:$0xff] (!%p146_p9)  ;;  %v185_v10 = vld [vmem:[%s154_s27 + $0x18] sm:$0xff] (!%p146_p9)  ;;  %v182_v11 = vld [vmem:[%s154_s27] sm:$0xff] (!%p146_p9)  ;;  %s654_s24 = scalar_lea.vmem (!%p146_p9), [#allocation3], %s482_s23 }
  0x20   : > { %v498_v12 = vpack.c.bf16 (!%p146_p9), %v185_v10, %v183_v9  ;;  %v184_v13 = vld [vmem:[%s154_s27 + $0x10] sm:$0xff] (!%p146_p9)  ;;  %v187_v14 = vld [vmem:[%s154_s27 + $0x28] sm:$0xff] (!%p146_p9)  ;;  %v189_v15 = vld [vmem:[%s154_s27 + $0x38] sm:$0xff] (!%p146_p9) }
  0x21   : > { %v500_v16 = vpack.c.bf16 (!%p146_p9), %v184_v13, %v182_v11  ;;  %v502_v17 = vpack.c.bf16 (!%p146_p9), %v189_v15, %v187_v14  ;;  %v186_v18 = vld [vmem:[%s154_s27 + $0x20] sm:$0xff] (!%p146_p9)  ;;  %v188_v19 = vld [vmem:[%s154_s27 + $0x30] sm:$0xff] (!%p146_p9)  ;;  %v181_v28 = vld [vmem:[%s706_s1 + $0x38] sm:$0xff] (!%p146_p9) }
  0x22   : > { %499 = vmatprep.subr.bf16.mxu0 (!%p146_p9), %v498_v12  ;;  %506 = vmatprep.subr.bf16.mxu1 (!%p146_p9), %v498_v12  ;;  %v504_v20 = vpack.c.bf16 (!%p146_p9), %v188_v19, %v186_v18 }
  0x23   : > { %501 = vmatpush1.bf16.msra.mxu0 (!%p146_p9), %v500_v16  ;;  %508 = vmatpush1.bf16.msra.mxu1 (!%p146_p9), %v500_v16 }
  0x24   : > { %503 = vmatprep.subr.bf16.mxu0 %v502_v17  ;;  %507 = vmatprep.subr.bf16.mxu1 %v502_v17  ;;  %s497_s9 = sshll.u32 (%p605_p5), %s473_s12, 4 }
  0x25   : > { %s369_s17 = scalar_lea.vmem (%p605_p5), %s707_s2, %s497_s9 }
  0x27   : > { %505 = vmatpush1.bf16.msra.mxu0 %v504_v20  ;;  %509 = vmatpush1.bf16.msra.mxu1 %v504_v20 }
  0x2a   : > { %483 = vmatmul.mubr.msk.f32.vlgmr.msra.gmra.mrb[0].mxu0 %vm190_vm0, %v174_v21  ;;  %487 = vmatmul.mubr.msk.f32.vlgmr.msra.gmra.mrb[0].mxu1 %vm190_vm0, %v178_v22 }
  0x2b   : > { %285 = vmatprep.mubr.f32.mxu0 %v559_v8  ;;  %309 = vmatprep.mubr.f32.mxu1 %v559_v8 }
  0x2e   : > { %484 = vmatmul.mubr.msk.f32.gmra.mrb[2].mxu0 %vm190_vm0, %v175_v23  ;;  %488 = vmatmul.mubr.msk.f32.gmra.mrb[2].mxu1 %vm190_vm0, %v179_v24 }
  0x2f   : > { %291 = vmatprep.mubr.f32.mxu0 %v559_v8  ;;  %315 = vmatprep.mubr.f32.mxu1 %v559_v8 }
  0x32   : > { %485 = vmatmul.mubr.msk.f32.gmra.mrb[4].mxu0 %vm190_vm0, %v176_v25  ;;  %489 = vmatmul.mubr.msk.f32.gmra.mrb[4].mxu1 %vm190_vm0, %v180_v26 }
  0x33   : > { %297 = vmatprep.mubr.f32.mxu0 %v559_v8  ;;  %321 = vmatprep.mubr.f32.mxu1 %v559_v8 }
  0x36   : > { %486 = vmatmul.mubr.msk.f32.gmra.mrb[6].mxu0 %vm190_vm0, %v177_v27  ;;  %490 = vmatmul.mubr.msk.f32.gmra.mrb[6].mxu1 %vm190_vm0, %v181_v28 }
  0xfd   : > { %v281_v29 = vpop.f32.mrb[0].mxu0  ;;  %v305_v30 = vpop.f32.mrb[0].mxu1 }
  0xfe   : > { %v328_v31 = vmax.f32 %v281_v29, 0.0  ;;  %v336_v32 = vmax.f32 %v305_v30, 0.0  ;;  %v283_v33 = vpop.f32.mrb[1].mxu0  ;;  %v307_v34 = vpop.f32.mrb[1].mxu1 }
  0xff   : > { %v329_v35 = vmax.f32 %v283_v33, 0.0  ;;  %v337_v36 = vmax.f32 %v307_v34, 0.0 }
 0x100   : > { %344 = vst [vmem:[%s654_s24] sm:$0xff] %v328_v31  ;;  %352 = vst [vmem:[%s654_s24 + $0x40] sm:$0xff] %v336_v32 }
 0x101   : > { %345 = vst [vmem:[%s654_s24 + $0x8] sm:$0xff] %v329_v35  ;;  %353 = vst [vmem:[%s654_s24 + $0x48] sm:$0xff] %v337_v36  ;;  %v287_v37 = vpop.f32.mrb[2].mxu0  ;;  %v311_v38 = vpop.f32.mrb[2].mxu1 }
 0x102   : > { %v330_v39 = vmax.f32 %v287_v37, 0.0  ;;  %v338_v40 = vmax.f32 %v311_v38, 0.0  ;;  %v289_v41 = vpop.f32.mrb[3].mxu0  ;;  %v313_v42 = vpop.f32.mrb[3].mxu1 }
 0x103   : > { %v331_v43 = vmax.f32 %v289_v41, 0.0  ;;  %v339_v44 = vmax.f32 %v313_v42, 0.0 }
 0x104   : > { %346 = vst [vmem:[%s654_s24 + $0x10] sm:$0xff] %v330_v39  ;;  %354 = vst [vmem:[%s654_s24 + $0x50] sm:$0xff] %v338_v40 }
 0x105   : > { %347 = vst [vmem:[%s654_s24 + $0x18] sm:$0xff] %v331_v43  ;;  %355 = vst [vmem:[%s654_s24 + $0x58] sm:$0xff] %v339_v44  ;;  %v293_v45 = vpop.f32.mrb[4].mxu0  ;;  %v317_v46 = vpop.f32.mrb[4].mxu1 }
 0x106   : > { %v332_v47 = vmax.f32 %v293_v45, 0.0  ;;  %v340_v48 = vmax.f32 %v317_v46, 0.0  ;;  %v295_v49 = vpop.f32.mrb[5].mxu0  ;;  %v319_v50 = vpop.f32.mrb[5].mxu1 }
 0x107   : > { %v333_v51 = vmax.f32 %v295_v49, 0.0  ;;  %v341_v52 = vmax.f32 %v319_v50, 0.0  ;;  %366 = sbr.rel (!%p605_p5) target bundleno = 279 (0x117), region = 55  ;;  %v382_v61 = vld [vmem:[%s654_s24] sm:$0xff] (%p605_p5) }
 0x108   : > { %348 = vst [vmem:[%s654_s24 + $0x20] sm:$0xff] %v332_v47  ;;  %356 = vst [vmem:[%s654_s24 + $0x60] sm:$0xff] %v340_v48  ;;  %v384_v62 = vld [vmem:[%s654_s24 + $0x8] sm:$0xff] (%p605_p5)  ;;  %v398_v5 = vld [vmem:[%s654_s24 + $0x40] sm:$0xff] (%p605_p5) }
 0x109   : > { %349 = vst [vmem:[%s654_s24 + $0x28] sm:$0xff] %v333_v51  ;;  %357 = vst [vmem:[%s654_s24 + $0x68] sm:$0xff] %v341_v52  ;;  %v299_v53 = vpop.f32.mrb[6].mxu0  ;;  %v323_v54 = vpop.f32.mrb[6].mxu1  ;;  %v400_v6 = vld [vmem:[%s654_s24 + $0x48] sm:$0xff] (%p605_p5) }
 0x10a   : > { %v334_v55 = vmax.f32 %v299_v53, 0.0  ;;  %v342_v56 = vmax.f32 %v323_v54, 0.0  ;;  %v301_v57 = vpop.f32.mrb[7].mxu0  ;;  %v325_v58 = vpop.f32.mrb[7].mxu1  ;;  %383 = vst [vmem:[%s369_s17] sm:$0xff] (%p605_p5), %v382_v61  ;;  %385 = vst [vmem:[%s369_s17 + $0x8] sm:$0xff] (%p605_p5), %v384_v62 }
 0x10b   : > { %v335_v59 = vmax.f32 %v301_v57, 0.0  ;;  %v343_v60 = vmax.f32 %v325_v58, 0.0  ;;  %v386_v63 = vld [vmem:[%s654_s24 + $0x10] sm:$0xff] (%p605_p5)  ;;  %399 = vst [vmem:[%s369_s17 + $0x80] sm:$0xff] (%p605_p5), %v398_v5  ;;  %401 = vst [vmem:[%s369_s17 + $0x88] sm:$0xff] (%p605_p5), %v400_v6 }
 0x10c   : > { %350 = vst [vmem:[%s654_s24 + $0x30] sm:$0xff] %v334_v55  ;;  %358 = vst [vmem:[%s654_s24 + $0x70] sm:$0xff] %v342_v56  ;;  %v388_v0 = vld [vmem:[%s654_s24 + $0x18] sm:$0xff] (%p605_p5)  ;;  %v402_v7 = vld [vmem:[%s654_s24 + $0x50] sm:$0xff] (%p605_p5) }
 0x10d   : > { %351 = vst [vmem:[%s654_s24 + $0x38] sm:$0xff] %v335_v59  ;;  %359 = vst [vmem:[%s654_s24 + $0x78] sm:$0xff] %v343_v60  ;;  %v404_v8 = vld [vmem:[%s654_s24 + $0x58] sm:$0xff] (%p605_p5) }
 0x10e   : > { %387 = vst [vmem:[%s369_s17 + $0x20] sm:$0xff] %v386_v63  ;;  %389 = vst [vmem:[%s369_s17 + $0x28] sm:$0xff] %v388_v0 }
 0x10f   : > { %v390_v1 = vld [vmem:[%s654_s24 + $0x20] sm:$0xff]  ;;  %403 = vst [vmem:[%s369_s17 + $0xa0] sm:$0xff] %v402_v7  ;;  %405 = vst [vmem:[%s369_s17 + $0xa8] sm:$0xff] %v404_v8 }
 0x110   : > { %v392_v2 = vld [vmem:[%s654_s24 + $0x28] sm:$0xff]  ;;  %391 = vst [vmem:[%s369_s17 + $0x40] sm:$0xff] %v390_v1  ;;  %v406_v9 = vld [vmem:[%s654_s24 + $0x60] sm:$0xff] }
 0x111   : > { %393 = vst [vmem:[%s369_s17 + $0x48] sm:$0xff] %v392_v2  ;;  %v408_v10 = vld [vmem:[%s654_s24 + $0x68] sm:$0xff]  ;;  %407 = vst [vmem:[%s369_s17 + $0xc0] sm:$0xff] %v406_v9 }
 0x112   : > { %409 = vst [vmem:[%s369_s17 + $0xc8] sm:$0xff] %v408_v10 }
 0x113   : > { %v394_v3 = vld [vmem:[%s654_s24 + $0x30] sm:$0xff] }
 0x114   : > { %v396_v4 = vld [vmem:[%s654_s24 + $0x38] sm:$0xff]  ;;  %395 = vst [vmem:[%s369_s17 + $0x60] sm:$0xff] %v394_v3  ;;  %v410_v11 = vld [vmem:[%s654_s24 + $0x70] sm:$0xff] }
 0x115   : > { %397 = vst [vmem:[%s369_s17 + $0x68] sm:$0xff] %v396_v4  ;;  %411 = vst [vmem:[%s369_s17 + $0xe0] sm:$0xff] %v410_v11  ;;  %v412_v12 = vld [vmem:[%s654_s24 + $0x78] sm:$0xff] }
 0x116   : > { %413 = vst [vmem:[%s369_s17 + $0xe8] sm:$0xff] %v412_v12 }
 0x117 PF: > { %p9_p10 = scmp.ge.s32.totalorder %s592_s13, 4   ;;  %s709_s9 = smov %s553_s10 }
 0x118   : > { %s710_s10 = smov %s603_s16  ;;  %s711_s11 = smov %s592_s13 }
 0x119   :  { %11 = sbr.rel (!%p9_p10) target bundleno = 2 (0x2), region = 109 }

</bundles_post_ra>
